<compile_context>
chip_gen: v5e
topology: v5e:2x2
jax: 0.10.0
libtpu: 0.0.40
codegen_flags: <defaults>
</compile_context>

<pallas_src>
import functools

import jax
import jax.numpy as jnp
from jax.experimental import pallas as pl
from jax.experimental.pallas import tpu as pltpu

BN_EPS = 1e-5
_VMEM_LIMIT_BYTES = 32 * 1024 * 1024  # safe on v5e/v6e (128 MiB) and v7x (64 MiB)
_TILE_N = 1024          # batch rows per grid step (tiled path)
_FUSED_MAX_ROWS = 1024  # batches up to this size use the single fused kernel
_NUM_SHARDS = 2         # leading "parallel" grid axis (both TCs on v7x; harmless on 1-TC chips)


# --------------------------------------------------------------------------
# Fused small-batch kernel: whole forward pass in one pallas_call
# --------------------------------------------------------------------------
def _fused_dae_kernel(x_ref, *refs, num_layers, relu_flags):
    o_ref = refs[-1]
    h = x_ref[...].astype(jnp.float32)
    inv_n = 1.0 / h.shape[0]

    for layer in range(num_layers):
        g_ref, be_ref, w_ref, b_ref = refs[4 * layer: 4 * layer + 4]

        # Full-batch BatchNorm1d statistics of the current activation (f32).
        s1 = jnp.sum(h, axis=0, keepdims=True)
        s2 = jnp.sum(h * h, axis=0, keepdims=True)
        mean = s1 * inv_n
        var = jnp.maximum(s2 * inv_n - mean * mean, 0.0)   # biased variance
        scale = g_ref[...] * jax.lax.rsqrt(var + BN_EPS)
        shift = be_ref[...] - mean * scale
        h_bn = h * scale + shift

        w = w_ref[...]
        y = jnp.dot(h_bn.astype(w.dtype), w,
                    preferred_element_type=jnp.float32) + b_ref[...]
        if relu_flags[layer]:
            y = jnp.maximum(y, 0.0)
        h = y

    o_ref[...] = h.astype(o_ref.dtype)


def _fused_forward(x, layer_params, relu_flags, matmul_dtype):
    n = x.shape[0]
    f_out = layer_params[-1][2].shape[1]

    inputs = [x]
    for (g, be, w, b) in layer_params:
        inputs += [g, be, w.astype(matmul_dtype), b]

    kernel = functools.partial(_fused_dae_kernel,
                               num_layers=len(layer_params),
                               relu_flags=tuple(relu_flags))
    # No grid: every operand is a single full-extent VMEM block (everything
    # here is a few hundred KiB at most).
    return pl.pallas_call(
        kernel,
        out_shape=jax.ShapeDtypeStruct((n, f_out), jnp.float32),
        compiler_params=pltpu.CompilerParams(
            vmem_limit_bytes=_VMEM_LIMIT_BYTES),
    )(*inputs)


# --------------------------------------------------------------------------
# Tiled large-batch kernels
# --------------------------------------------------------------------------
def _column_stats_kernel(x_ref, sum_ref, sq_ref):
    """Per-column sum / sum-of-squares of x across batch tiles (XLU reduce).

    Padded batch rows of x are exactly zero, so no masking is needed here.
    The (8, F) per-shard accumulator keeps the output block sublane-aligned.
    """
    i = pl.program_id(1)

    @pl.when(i == 0)
    def _init():
        sum_ref[...] = jnp.zeros_like(sum_ref)
        sq_ref[...] = jnp.zeros_like(sq_ref)

    x = x_ref[...].astype(jnp.float32)
    sum_ref[...] += jnp.sum(x, axis=0, keepdims=True)
    sq_ref[...] += jnp.sum(x * x, axis=0, keepdims=True)


def _dense_block_kernel(x_ref, w_ref, b_ref, y_ref, *stat_refs,
                        apply_relu, compute_stats, n_valid, tile_n,
                        tiles_per_shard):
    """y = act(x @ W_eff + b_eff); optionally accumulate column statistics of
    the (f32) output for the next layer's BatchNorm, per TensorCore shard."""
    c = pl.program_id(0)   # shard (parallel) axis
    i = pl.program_id(1)   # batch-tile (arbitrary / reduction) axis

    w = w_ref[...]
    x = x_ref[...].astype(w.dtype)
    y = jnp.dot(x, w, preferred_element_type=jnp.float32) + b_ref[...]
    if apply_relu:
        y = jnp.maximum(y, 0.0)
    y_ref[...] = y.astype(y_ref.dtype)

    if not compute_stats:
        return

    sum_ref, sq_ref = stat_refs

    @pl.when(i == 0)
    def _init():
        sum_ref[...] = jnp.zeros_like(sum_ref)
        sq_ref[...] = jnp.zeros_like(sq_ref)

    def _acc(v):
        # Column sums via sublane reduce (XLU/VPU) — keeps the MXU free.
        sum_ref[...] += jnp.sum(v, axis=0, keepdims=True)
        sq_ref[...] += jnp.sum(v * v, axis=0, keepdims=True)

    if n_valid is None:
        _acc(y)
    else:
        g_tile = c * tiles_per_shard + i
        needs_mask = (g_tile + 1) * tile_n > n_valid   # only tail tiles

        @pl.when(jnp.logical_not(needs_mask))
        def _unmasked():
            _acc(y)

        @pl.when(needs_mask)
        def _masked():
            rows = (jax.lax.broadcasted_iota(jnp.int32, (tile_n, 1), 0)
                    + g_tile * tile_n)
            _acc(jnp.where(rows < n_valid, y, 0.0))


def _collapse_stats(s_full):
    # Each shard's (8, F) slot holds 8 identical rows; take row 0 per shard
    # and sum the per-shard partials. O(F) work on the host side of the graph.
    return s_full[0::8].sum(axis=0, keepdims=True)


def _column_stats(x, *, tile_n, num_shards, tiles_per_shard):
    n_pad, f = x.shape
    s1, s2 = pl.pallas_call(
        _column_stats_kernel,
        out_shape=(jax.ShapeDtypeStruct((num_shards * 8, f), jnp.float32),
                   jax.ShapeDtypeStruct((num_shards * 8, f), jnp.float32)),
        grid_spec=pltpu.PrefetchScalarGridSpec(
            num_scalar_prefetch=0,
            grid=(num_shards, tiles_per_shard),
            in_specs=[pl.BlockSpec(
                (tile_n, f), lambda c, i: (c * tiles_per_shard + i, 0))],
            out_specs=[pl.BlockSpec((8, f), lambda c, i: (c, 0)),
                       pl.BlockSpec((8, f), lambda c, i: (c, 0))],
        ),
        compiler_params=pltpu.CompilerParams(
            dimension_semantics=("parallel", "arbitrary"),
            vmem_limit_bytes=_VMEM_LIMIT_BYTES),
    )(x)
    return _collapse_stats(s1), _collapse_stats(s2)


def _dense_block(h, w_eff, b_eff, *, apply_relu, compute_stats, tile_n,
                 num_shards, tiles_per_shard, n_valid, out_dtype, alias_input):
    n_pad, f_in = h.shape
    f_out = w_eff.shape[1]
    kernel = functools.partial(
        _dense_block_kernel, apply_relu=apply_relu, compute_stats=compute_stats,
        n_valid=n_valid, tile_n=tile_n, tiles_per_shard=tiles_per_shard)

    y_shape = jax.ShapeDtypeStruct((n_pad, f_out), out_dtype)
    y_spec = pl.BlockSpec((tile_n, f_out),
                          lambda c, i: (c * tiles_per_shard + i, 0))
    if compute_stats:
        out_shape = (y_shape,
                     jax.ShapeDtypeStruct((num_shards * 8, f_out), jnp.float32),
                     jax.ShapeDtypeStruct((num_shards * 8, f_out), jnp.float32))
        out_specs = [y_spec,
                     pl.BlockSpec((8, f_out), lambda c, i: (c, 0)),
                     pl.BlockSpec((8, f_out), lambda c, i: (c, 0))]
    else:
        out_shape = y_shape
        out_specs = y_spec

    extra = {}
    if alias_input and h.dtype == out_dtype and f_in == f_out:
        # Donate the previous activation buffer as this block's y buffer.
        extra["input_output_aliases"] = {0: 0}

    outs = pl.pallas_call(
        kernel,
        out_shape=out_shape,
        grid_spec=pltpu.PrefetchScalarGridSpec(
            num_scalar_prefetch=0,
            grid=(num_shards, tiles_per_shard),
            in_specs=[
                pl.BlockSpec((tile_n, f_in),
                             lambda c, i: (c * tiles_per_shard + i, 0)),
                # TODO(synk): add K-tiling of W_eff (f32 accumulator scratch) and
                # Buffered(1) weight/bias blocks once hidden sizes are large
                # enough for weight VMEM residency to matter (esp. v7x 64 MiB).
                pl.BlockSpec((f_in, f_out), lambda c, i: (0, 0)),
                pl.BlockSpec((1, f_out), lambda c, i: (0, 0)),
            ],
            out_specs=out_specs,
        ),
        compiler_params=pltpu.CompilerParams(
            # shard axis parallel (megacore on v7x); tile axis is the stats
            # reduction axis, so it must stay "arbitrary".
            dimension_semantics=("parallel", "arbitrary"),
            vmem_limit_bytes=_VMEM_LIMIT_BYTES),
        **extra,
    )(h, w_eff, b_eff)

    if compute_stats:
        y, s1f, s2f = outs
        return y, (_collapse_stats(s1f), _collapse_stats(s2f))
    return outs, None


# --------------------------------------------------------------------------
# Host-side folding / padding helpers (tiny O(F^2) vs the O(N*F) kernel work)
# --------------------------------------------------------------------------
def _round_up(v, m):
    return ((v + m - 1) // m) * m


def _pad2(a, rows, cols, value=0.0):
    pr, pc = rows - a.shape[0], cols - a.shape[1]
    if pr == 0 and pc == 0:
        return a
    return jnp.pad(a, ((0, pr), (0, pc)), constant_values=value)


def _fold_bn_into_linear(stats, n_rows, gamma, beta, w, b):
    """Fold training-mode BatchNorm1d (full-batch stats) into the Linear that
    follows it:  BN(x) @ W + b  ==  x @ W_eff + b_eff."""
    s1, s2 = stats
    inv_n = 1.0 / float(n_rows)
    mean = s1 * inv_n                                   # (1, F_in)
    var = jnp.maximum(s2 * inv_n - mean * mean, 0.0)    # biased variance
    scale = gamma * jax.lax.rsqrt(var + BN_EPS)         # (1, F_in)
    shift = beta - mean * scale                         # (1, F_in)
    w_eff = w * jnp.transpose(scale)                    # (F_in, F_out)
    b_eff = b + shift @ w                               # (1, F_out)
    return w_eff, b_eff


def _tiled_forward(x, layer_params, relu_flags, matmul_dtype, act_dtype):
    n, _ = x.shape
    out_cols = layer_params[-1][2].shape[1]

    tile_n = _TILE_N
    num_tiles = -(-n // tile_n)
    num_shards = _NUM_SHARDS if num_tiles >= 2 else 1
    tiles_per_shard = -(-num_tiles // num_shards)
    n_pad = num_shards * tiles_per_shard * tile_n
    n_valid = None if n_pad == n else n

    # Batch rows padded with zeros to the grid extent; features stay at their
    # natural width (full-extent last-dim block) — no lane padding of x.
    h = x.astype(jnp.float32)
    if n_pad != n:
        h = jnp.pad(h, ((0, n_pad - n), (0, 0)))

    # Full-batch statistics of x for the first BatchNorm.
    stats = _column_stats(h, tile_n=tile_n, num_shards=num_shards,
                          tiles_per_shard=tiles_per_shard)

    num_layers = len(layer_params)
    for idx, ((gamma, beta, w, b), relu) in enumerate(zip(layer_params,
                                                          relu_flags)):
        is_last = idx == num_layers - 1
        f_in_p = h.shape[1]
        f_out_p = _round_up(w.shape[1], 128)   # lane-dense outputs

        # Zero/one padding keeps padded lanes exactly zero through the net.
        gamma_p = _pad2(gamma, 1, f_in_p, value=1.0)
        beta_p = _pad2(beta, 1, f_in_p)
        w_p = _pad2(w, f_in_p, f_out_p)
        b_p = _pad2(b, 1, f_out_p)

        w_eff, b_eff = _fold_bn_into_linear(stats, n, gamma_p, beta_p, w_p, b_p)

        out_dtype = jnp.float32 if is_last else act_dtype
        h, stats = _dense_block(
            h, w_eff.astype(matmul_dtype), b_eff,
            apply_relu=relu, compute_stats=not is_last,
            tile_n=tile_n, num_shards=num_shards,
            tiles_per_shard=tiles_per_shard, n_valid=n_valid,
            out_dtype=out_dtype, alias_input=(idx > 0))

    return h[:n, :out_cols]


# --------------------------------------------------------------------------
# Forward pass
# --------------------------------------------------------------------------
@functools.partial(jax.jit, static_argnames=("matmul_dtype", "act_dtype"))
def dae_forward(x, params, matmul_dtype=jnp.float32, act_dtype=jnp.float32):
    layer_params = [
        (params["e_g0"], params["e_b0"], params["e_w0"], params["e_bi0"]),
        (params["e_g1"], params["e_b1"], params["e_w1"], params["e_bi1"]),
        (params["d_g0"], params["d_b0"], params["d_w0"], params["d_bi0"]),
        (params["d_g1"], params["d_b1"], params["d_w1"], params["d_bi1"]),
    ]
    relu_flags = (True, True, True, False)

    if x.shape[0] <= _FUSED_MAX_ROWS:
        return _fused_forward(x, layer_params, relu_flags, matmul_dtype)
    return _tiled_forward(x, layer_params, relu_flags, matmul_dtype, act_dtype)


# --------------------------------------------------------------------------
# Parameters and pure-JAX reference
# --------------------------------------------------------------------------
def make_params(key, input_size, hidden_size1, hidden_size2):
    """Deterministic synthetic parameters (shapes follow the PyTorch module)."""
    ks = jax.random.split(key, 16)

    def lin(kw, kb, fan_in, fan_out):
        # (in, out) layout so the kernel computes x @ W + b.
        w = (jax.random.normal(kw, (fan_in, fan_out), jnp.float32)
             / jnp.sqrt(jnp.float32(fan_in)))
        b = jax.random.normal(kb, (1, fan_out), jnp.float32) * 0.01
        return w, b

    def bn(kg, kb, feat):
        g = 1.0 + 0.1 * jax.random.normal(kg, (1, feat), jnp.float32)
        b = 0.1 * jax.random.normal(kb, (1, feat), jnp.float32)
        return g, b

    p = {}
    p["e_g0"], p["e_b0"] = bn(ks[0], ks[1], input_size)
    p["e_w0"], p["e_bi0"] = lin(ks[2], ks[3], input_size, hidden_size1)
    p["e_g1"], p["e_b1"] = bn(ks[4], ks[5], hidden_size1)
    p["e_w1"], p["e_bi1"] = lin(ks[6], ks[7], hidden_size1, hidden_size2)
    p["d_g0"], p["d_b0"] = bn(ks[8], ks[9], hidden_size2)
    p["d_w0"], p["d_bi0"] = lin(ks[10], ks[11], hidden_size2, hidden_size1)
    p["d_g1"], p["d_b1"] = bn(ks[12], ks[13], hidden_size1)
    p["d_w1"], p["d_bi1"] = lin(ks[14], ks[15], hidden_size1, input_size)
    return p


def dae_reference(x, params):
    """Pure-JAX reference (training-mode BatchNorm1d, biased variance)."""
    def bn(h, g, b):
        m = jnp.mean(h, axis=0, keepdims=True)
        v = jnp.mean((h - m) ** 2, axis=0, keepdims=True)
        return (h - m) * jax.lax.rsqrt(v + BN_EPS) * g + b

    h = x
    h = bn(h, params["e_g0"], params["e_b0"])
    h = jnp.maximum(h @ params["e_w0"] + params["e_bi0"], 0.0)
    h = bn(h, params["e_g1"], params["e_b1"])
    h = jnp.maximum(h @ params["e_w1"] + params["e_bi1"], 0.0)
    h = bn(h, params["d_g0"], params["d_b0"])
    h = jnp.maximum(h @ params["d_w0"] + params["d_bi0"], 0.0)
    h = bn(h, params["d_g1"], params["d_b1"])
    h = h @ params["d_w1"] + params["d_bi1"]
    return h


# --------------------------------------------------------------------------
if __name__ == "__main__":
    input_size, hidden_size1, hidden_size2 = 32, 64, 16

    key = jax.random.PRNGKey(0)
    kx1, kx2, kp = jax.random.split(key, 3)
    params = make_params(kp, input_size, hidden_size1, hidden_size2)

    # ---- small batch: single fused kernel path (f32, bit-close) ----
    x_small = jax.random.normal(kx1, (8, input_size), jnp.float32)
    ref_s = dae_reference(x_small, params)
    out_s = jax.block_until_ready(dae_forward(x_small, params))
    assert out_s.shape == (8, input_size), out_s.shape
    assert jnp.allclose(out_s, ref_s, atol=2e-3, rtol=2e-3), (
        float(jnp.max(jnp.abs(out_s - ref_s))))

    # ---- larger batch: tiled / shard-parallel path (f32, bit-close) ----
    # 2100 rows -> 3 batch tiles of 1024, 2 shards, tail-tile row masking and
    # one fully padded tile, exercising every tiled-path code path.
    x_large = jax.random.normal(kx2, (2100, input_size), jnp.float32)
    ref_l = dae_reference(x_large, params)
    out_l = jax.block_until_ready(dae_forward(x_large, params))
    assert out_l.shape == (2100, input_size), out_l.shape
    assert jnp.allclose(out_l, ref_l, atol=5e-3, rtol=5e-3), (
        float(jnp.max(jnp.abs(out_l - ref_l))))

    # ---- tiled path, bf16 MXU operands + bf16 activation storage (v6e/v7x).
    # BN statistics remain f32 (computed before the storage cast). Loose check
    # vs the f32 reference — this is the throughput path, not the bit-close one.
    out_bf = jax.block_until_ready(
        dae_forward(x_large, params,
                    matmul_dtype=jnp.bfloat16, act_dtype=jnp.bfloat16))
    assert out_bf.shape == (2100, input_size), out_bf.shape
    assert bool(jnp.all(jnp.isfinite(out_bf)))
    assert float(jnp.mean(jnp.abs(out_bf - ref_l))) < 0.2, (
        float(jnp.mean(jnp.abs(out_bf - ref_l))))

    print("KERNEL_OK")
</pallas_src>

<mosaic_0001>
module attributes {stable_mosaic.version = 11 : i64} {
  func.func @_fused_dae_kernel(%arg0: memref<8x32xf32, #tpu.memory_space<vmem>>, %arg1: memref<1x32xf32, #tpu.memory_space<vmem>>, %arg2: memref<1x32xf32, #tpu.memory_space<vmem>>, %arg3: memref<32x64xf32, #tpu.memory_space<vmem>>, %arg4: memref<1x64xf32, #tpu.memory_space<vmem>>, %arg5: memref<1x64xf32, #tpu.memory_space<vmem>>, %arg6: memref<1x64xf32, #tpu.memory_space<vmem>>, %arg7: memref<64x16xf32, #tpu.memory_space<vmem>>, %arg8: memref<1x16xf32, #tpu.memory_space<vmem>>, %arg9: memref<1x16xf32, #tpu.memory_space<vmem>>, %arg10: memref<1x16xf32, #tpu.memory_space<vmem>>, %arg11: memref<16x64xf32, #tpu.memory_space<vmem>>, %arg12: memref<1x64xf32, #tpu.memory_space<vmem>>, %arg13: memref<1x64xf32, #tpu.memory_space<vmem>>, %arg14: memref<1x64xf32, #tpu.memory_space<vmem>>, %arg15: memref<64x32xf32, #tpu.memory_space<vmem>>, %arg16: memref<1x32xf32, #tpu.memory_space<vmem>>, %arg17: memref<8x32xf32, #tpu.memory_space<vmem>>) attributes {dimension_semantics = [], scalar_prefetch = 0 : i64, scratch_operands = 0 : i64, tpu.core_type = #tpu.core_type<tc>} {
    %c0 = arith.constant 0 : index
    %c0_0 = arith.constant 0 : index
    %0 = vector.load %arg0[%c0, %c0_0] : memref<8x32xf32, #tpu.memory_space<vmem>>, vector<8x32xf32>
    %cst = arith.constant dense<0.000000e+00> : vector<32xf32>
    %1 = vector.multi_reduction <add>, %0, %cst [0] : vector<8x32xf32> to vector<32xf32>
    %2 = vector.shape_cast %1 : vector<32xf32> to vector<1x32xf32>
    %3 = arith.mulf %0, %0 : vector<8x32xf32>
    %cst_1 = arith.constant dense<0.000000e+00> : vector<32xf32>
    %4 = vector.multi_reduction <add>, %3, %cst_1 [0] : vector<8x32xf32> to vector<32xf32>
    %5 = vector.shape_cast %4 : vector<32xf32> to vector<1x32xf32>
    %cst_2 = arith.constant 1.250000e-01 : f32
    %6 = vector.broadcast %cst_2 : f32 to vector<1x32xf32>
    %7 = arith.mulf %2, %6 : vector<1x32xf32>
    %cst_3 = arith.constant 1.250000e-01 : f32
    %8 = vector.broadcast %cst_3 : f32 to vector<1x32xf32>
    %9 = arith.mulf %5, %8 : vector<1x32xf32>
    %10 = arith.mulf %7, %7 : vector<1x32xf32>
    %11 = arith.subf %9, %10 : vector<1x32xf32>
    %cst_4 = arith.constant 0.000000e+00 : f32
    %12 = vector.broadcast %cst_4 : f32 to vector<1x32xf32>
    %13 = arith.maximumf %11, %12 : vector<1x32xf32>
    %c0_5 = arith.constant 0 : index
    %c0_6 = arith.constant 0 : index
    %14 = vector.load %arg1[%c0_5, %c0_6] : memref<1x32xf32, #tpu.memory_space<vmem>>, vector<1x32xf32>
    %cst_7 = arith.constant 9.99999974E-6 : f32
    %15 = vector.broadcast %cst_7 : f32 to vector<1x32xf32>
    %16 = arith.addf %13, %15 : vector<1x32xf32>
    %17 = math.rsqrt %16 : vector<1x32xf32>
    %18 = arith.mulf %14, %17 : vector<1x32xf32>
    %c0_8 = arith.constant 0 : index
    %c0_9 = arith.constant 0 : index
    %19 = vector.load %arg2[%c0_8, %c0_9] : memref<1x32xf32, #tpu.memory_space<vmem>>, vector<1x32xf32>
    %20 = arith.mulf %7, %18 : vector<1x32xf32>
    %21 = arith.subf %19, %20 : vector<1x32xf32>
    %22 = vector.broadcast %18 : vector<1x32xf32> to vector<8x32xf32>
    %23 = arith.mulf %0, %22 : vector<8x32xf32>
    %24 = vector.broadcast %21 : vector<1x32xf32> to vector<8x32xf32>
    %25 = arith.addf %23, %24 : vector<8x32xf32>
    %c0_10 = arith.constant 0 : index
    %c0_11 = arith.constant 0 : index
    %26 = vector.load %arg3[%c0_10, %c0_11] : memref<32x64xf32, #tpu.memory_space<vmem>>, vector<32x64xf32>
    %cst_12 = arith.constant dense<0.000000e+00> : vector<8x64xf32>
    %27 = tpu.matmul %25, %26, %cst_12 {dimension_numbers = #tpu.dot_dimension_numbers<[1], [0], [0], [1], [0, 0, 1, 1], [], []>} : vector<8x32xf32>, vector<32x64xf32>, vector<8x64xf32> -> vector<8x64xf32>
    %c0_13 = arith.constant 0 : index
    %c0_14 = arith.constant 0 : index
    %28 = vector.load %arg4[%c0_13, %c0_14] : memref<1x64xf32, #tpu.memory_space<vmem>>, vector<1x64xf32>
    %29 = vector.broadcast %28 : vector<1x64xf32> to vector<8x64xf32>
    %30 = arith.addf %27, %29 : vector<8x64xf32>
    %cst_15 = arith.constant 0.000000e+00 : f32
    %31 = vector.broadcast %cst_15 : f32 to vector<8x64xf32>
    %32 = arith.maximumf %30, %31 : vector<8x64xf32>
    %cst_16 = arith.constant dense<0.000000e+00> : vector<64xf32>
    %33 = vector.multi_reduction <add>, %32, %cst_16 [0] : vector<8x64xf32> to vector<64xf32>
    %34 = vector.shape_cast %33 : vector<64xf32> to vector<1x64xf32>
    %35 = arith.mulf %32, %32 : vector<8x64xf32>
    %cst_17 = arith.constant dense<0.000000e+00> : vector<64xf32>
    %36 = vector.multi_reduction <add>, %35, %cst_17 [0] : vector<8x64xf32> to vector<64xf32>
    %37 = vector.shape_cast %36 : vector<64xf32> to vector<1x64xf32>
    %cst_18 = arith.constant 1.250000e-01 : f32
    %38 = vector.broadcast %cst_18 : f32 to vector<1x64xf32>
    %39 = arith.mulf %34, %38 : vector<1x64xf32>
    %cst_19 = arith.constant 1.250000e-01 : f32
    %40 = vector.broadcast %cst_19 : f32 to vector<1x64xf32>
    %41 = arith.mulf %37, %40 : vector<1x64xf32>
    %42 = arith.mulf %39, %39 : vector<1x64xf32>
    %43 = arith.subf %41, %42 : vector<1x64xf32>
    %cst_20 = arith.constant 0.000000e+00 : f32
    %44 = vector.broadcast %cst_20 : f32 to vector<1x64xf32>
    %45 = arith.maximumf %43, %44 : vector<1x64xf32>
    %c0_21 = arith.constant 0 : index
    %c0_22 = arith.constant 0 : index
    %46 = vector.load %arg5[%c0_21, %c0_22] : memref<1x64xf32, #tpu.memory_space<vmem>>, vector<1x64xf32>
    %cst_23 = arith.constant 9.99999974E-6 : f32
    %47 = vector.broadcast %cst_23 : f32 to vector<1x64xf32>
    %48 = arith.addf %45, %47 : vector<1x64xf32>
    %49 = math.rsqrt %48 : vector<1x64xf32>
    %50 = arith.mulf %46, %49 : vector<1x64xf32>
    %c0_24 = arith.constant 0 : index
    %c0_25 = arith.constant 0 : index
    %51 = vector.load %arg6[%c0_24, %c0_25] : memref<1x64xf32, #tpu.memory_space<vmem>>, vector<1x64xf32>
    %52 = arith.mulf %39, %50 : vector<1x64xf32>
    %53 = arith.subf %51, %52 : vector<1x64xf32>
    %54 = vector.broadcast %50 : vector<1x64xf32> to vector<8x64xf32>
    %55 = arith.mulf %32, %54 : vector<8x64xf32>
    %56 = vector.broadcast %53 : vector<1x64xf32> to vector<8x64xf32>
    %57 = arith.addf %55, %56 : vector<8x64xf32>
    %c0_26 = arith.constant 0 : index
    %c0_27 = arith.constant 0 : index
    %58 = vector.load %arg7[%c0_26, %c0_27] : memref<64x16xf32, #tpu.memory_space<vmem>>, vector<64x16xf32>
    %cst_28 = arith.constant dense<0.000000e+00> : vector<8x16xf32>
    %59 = tpu.matmul %57, %58, %cst_28 {dimension_numbers = #tpu.dot_dimension_numbers<[1], [0], [0], [1], [0, 0, 1, 1], [], []>} : vector<8x64xf32>, vector<64x16xf32>, vector<8x16xf32> -> vector<8x16xf32>
    %c0_29 = arith.constant 0 : index
    %c0_30 = arith.constant 0 : index
    %60 = vector.load %arg8[%c0_29, %c0_30] : memref<1x16xf32, #tpu.memory_space<vmem>>, vector<1x16xf32>
    %61 = vector.broadcast %60 : vector<1x16xf32> to vector<8x16xf32>
    %62 = arith.addf %59, %61 : vector<8x16xf32>
    %cst_31 = arith.constant 0.000000e+00 : f32
    %63 = vector.broadcast %cst_31 : f32 to vector<8x16xf32>
    %64 = arith.maximumf %62, %63 : vector<8x16xf32>
    %cst_32 = arith.constant dense<0.000000e+00> : vector<16xf32>
    %65 = vector.multi_reduction <add>, %64, %cst_32 [0] : vector<8x16xf32> to vector<16xf32>
    %66 = vector.shape_cast %65 : vector<16xf32> to vector<1x16xf32>
    %67 = arith.mulf %64, %64 : vector<8x16xf32>
    %cst_33 = arith.constant dense<0.000000e+00> : vector<16xf32>
    %68 = vector.multi_reduction <add>, %67, %cst_33 [0] : vector<8x16xf32> to vector<16xf32>
    %69 = vector.shape_cast %68 : vector<16xf32> to vector<1x16xf32>
    %cst_34 = arith.constant 1.250000e-01 : f32
    %70 = vector.broadcast %cst_34 : f32 to vector<1x16xf32>
    %71 = arith.mulf %66, %70 : vector<1x16xf32>
    %cst_35 = arith.constant 1.250000e-01 : f32
    %72 = vector.broadcast %cst_35 : f32 to vector<1x16xf32>
    %73 = arith.mulf %69, %72 : vector<1x16xf32>
    %74 = arith.mulf %71, %71 : vector<1x16xf32>
    %75 = arith.subf %73, %74 : vector<1x16xf32>
    %cst_36 = arith.constant 0.000000e+00 : f32
    %76 = vector.broadcast %cst_36 : f32 to vector<1x16xf32>
    %77 = arith.maximumf %75, %76 : vector<1x16xf32>
    %c0_37 = arith.constant 0 : index
    %c0_38 = arith.constant 0 : index
    %78 = vector.load %arg9[%c0_37, %c0_38] : memref<1x16xf32, #tpu.memory_space<vmem>>, vector<1x16xf32>
    %cst_39 = arith.constant 9.99999974E-6 : f32
    %79 = vector.broadcast %cst_39 : f32 to vector<1x16xf32>
    %80 = arith.addf %77, %79 : vector<1x16xf32>
    %81 = math.rsqrt %80 : vector<1x16xf32>
    %82 = arith.mulf %78, %81 : vector<1x16xf32>
    %c0_40 = arith.constant 0 : index
    %c0_41 = arith.constant 0 : index
    %83 = vector.load %arg10[%c0_40, %c0_41] : memref<1x16xf32, #tpu.memory_space<vmem>>, vector<1x16xf32>
    %84 = arith.mulf %71, %82 : vector<1x16xf32>
    %85 = arith.subf %83, %84 : vector<1x16xf32>
    %86 = vector.broadcast %82 : vector<1x16xf32> to vector<8x16xf32>
    %87 = arith.mulf %64, %86 : vector<8x16xf32>
    %88 = vector.broadcast %85 : vector<1x16xf32> to vector<8x16xf32>
    %89 = arith.addf %87, %88 : vector<8x16xf32>
    %c0_42 = arith.constant 0 : index
    %c0_43 = arith.constant 0 : index
    %90 = vector.load %arg11[%c0_42, %c0_43] : memref<16x64xf32, #tpu.memory_space<vmem>>, vector<16x64xf32>
    %cst_44 = arith.constant dense<0.000000e+00> : vector<8x64xf32>
    %91 = tpu.matmul %89, %90, %cst_44 {dimension_numbers = #tpu.dot_dimension_numbers<[1], [0], [0], [1], [0, 0, 1, 1], [], []>} : vector<8x16xf32>, vector<16x64xf32>, vector<8x64xf32> -> vector<8x64xf32>
    %c0_45 = arith.constant 0 : index
    %c0_46 = arith.constant 0 : index
    %92 = vector.load %arg12[%c0_45, %c0_46] : memref<1x64xf32, #tpu.memory_space<vmem>>, vector<1x64xf32>
    %93 = vector.broadcast %92 : vector<1x64xf32> to vector<8x64xf32>
    %94 = arith.addf %91, %93 : vector<8x64xf32>
    %cst_47 = arith.constant 0.000000e+00 : f32
    %95 = vector.broadcast %cst_47 : f32 to vector<8x64xf32>
    %96 = arith.maximumf %94, %95 : vector<8x64xf32>
    %cst_48 = arith.constant dense<0.000000e+00> : vector<64xf32>
    %97 = vector.multi_reduction <add>, %96, %cst_48 [0] : vector<8x64xf32> to vector<64xf32>
    %98 = vector.shape_cast %97 : vector<64xf32> to vector<1x64xf32>
    %99 = arith.mulf %96, %96 : vector<8x64xf32>
    %cst_49 = arith.constant dense<0.000000e+00> : vector<64xf32>
    %100 = vector.multi_reduction <add>, %99, %cst_49 [0] : vector<8x64xf32> to vector<64xf32>
    %101 = vector.shape_cast %100 : vector<64xf32> to vector<1x64xf32>
    %cst_50 = arith.constant 1.250000e-01 : f32
    %102 = vector.broadcast %cst_50 : f32 to vector<1x64xf32>
    %103 = arith.mulf %98, %102 : vector<1x64xf32>
    %cst_51 = arith.constant 1.250000e-01 : f32
    %104 = vector.broadcast %cst_51 : f32 to vector<1x64xf32>
    %105 = arith.mulf %101, %104 : vector<1x64xf32>
    %106 = arith.mulf %103, %103 : vector<1x64xf32>
    %107 = arith.subf %105, %106 : vector<1x64xf32>
    %cst_52 = arith.constant 0.000000e+00 : f32
    %108 = vector.broadcast %cst_52 : f32 to vector<1x64xf32>
    %109 = arith.maximumf %107, %108 : vector<1x64xf32>
    %c0_53 = arith.constant 0 : index
    %c0_54 = arith.constant 0 : index
    %110 = vector.load %arg13[%c0_53, %c0_54] : memref<1x64xf32, #tpu.memory_space<vmem>>, vector<1x64xf32>
    %cst_55 = arith.constant 9.99999974E-6 : f32
    %111 = vector.broadcast %cst_55 : f32 to vector<1x64xf32>
    %112 = arith.addf %109, %111 : vector<1x64xf32>
    %113 = math.rsqrt %112 : vector<1x64xf32>
    %114 = arith.mulf %110, %113 : vector<1x64xf32>
    %c0_56 = arith.constant 0 : index
    %c0_57 = arith.constant 0 : index
    %115 = vector.load %arg14[%c0_56, %c0_57] : memref<1x64xf32, #tpu.memory_space<vmem>>, vector<1x64xf32>
    %116 = arith.mulf %103, %114 : vector<1x64xf32>
    %117 = arith.subf %115, %116 : vector<1x64xf32>
    %118 = vector.broadcast %114 : vector<1x64xf32> to vector<8x64xf32>
    %119 = arith.mulf %96, %118 : vector<8x64xf32>
    %120 = vector.broadcast %117 : vector<1x64xf32> to vector<8x64xf32>
    %121 = arith.addf %119, %120 : vector<8x64xf32>
    %c0_58 = arith.constant 0 : index
    %c0_59 = arith.constant 0 : index
    %122 = vector.load %arg15[%c0_58, %c0_59] : memref<64x32xf32, #tpu.memory_space<vmem>>, vector<64x32xf32>
    %cst_60 = arith.constant dense<0.000000e+00> : vector<8x32xf32>
    %123 = tpu.matmul %121, %122, %cst_60 {dimension_numbers = #tpu.dot_dimension_numbers<[1], [0], [0], [1], [0, 0, 1, 1], [], []>} : vector<8x64xf32>, vector<64x32xf32>, vector<8x32xf32> -> vector<8x32xf32>
    %c0_61 = arith.constant 0 : index
    %c0_62 = arith.constant 0 : index
    %124 = vector.load %arg16[%c0_61, %c0_62] : memref<1x32xf32, #tpu.memory_space<vmem>>, vector<1x32xf32>
    %125 = vector.broadcast %124 : vector<1x32xf32> to vector<8x32xf32>
    %126 = arith.addf %123, %125 : vector<8x32xf32>
    %c0_63 = arith.constant 0 : index
    %c0_64 = arith.constant 0 : index
    %127 = vector.load %arg17[%c0_63, %c0_64] : memref<8x32xf32, #tpu.memory_space<vmem>>, vector<8x32xf32>
    tpu.vector_store %arg17[%c0_63, %c0_64], %126 {strides = array<i32>} : memref<8x32xf32, #tpu.memory_space<vmem>>, vector<8x32xf32>,
    return
  }
}

</mosaic_0001>

<bundles_post_ra>
// kernel: dae_forward.1
= control target key start
LH: loop header
LB: loop body
LE: loop exit
PB: predicated region body
PF: predicated region fallthrough
CT: control target
= control target key end

     0   :  { %s642_s0 = inlined_call_operand.vmem [shape: f32[8,32], index: 0, kind: input, shape index: {}]   ;;  %s643_s1 = inlined_call_operand.vmem [shape: f32[1,32], index: 1, kind: input, shape index: {}]   ;;  %s644_s2 = inlined_call_operand.vmem [shape: f32[1,32], index: 2, kind: input, shape index: {}]   ;;  %s645_s3 = inlined_call_operand.vmem [shape: f32[32,64], index: 3, kind: input, shape index: {}]   ;;  %s646_s4 = inlined_call_operand.vmem [shape: f32[1,64], index: 4, kind: input, shape index: {}]   ;;  %s647_s5 = inlined_call_operand.vmem [shape: f32[1,64], index: 5, kind: input, shape index: {}]   ;;  %s648_s6 = inlined_call_operand.vmem [shape: f32[1,64], index: 6, kind: input, shape index: {}]   ;;  %s649_s7 = inlined_call_operand.vmem [shape: f32[64,16], index: 7, kind: input, shape index: {}]   ;;  %s650_s8 = inlined_call_operand.vmem [shape: f32[1,16], index: 8, kind: input, shape index: {}]   ;;  %s651_s9 = inlined_call_operand.vmem [shape: f32[1,16], index: 9, kind: input, shape index: {}]   ;;  %s652_s10 = inlined_call_operand.vmem [shape: f32[1,16], index: 10, kind: input, shape index: {}]   ;;  %s653_s11 = inlined_call_operand.vmem [shape: f32[16,64], index: 11, kind: input, shape index: {}]   ;;  %s654_s12 = inlined_call_operand.vmem [shape: f32[1,64], index: 12, kind: input, shape index: {}]   ;;  %s655_s13 = inlined_call_operand.vmem [shape: f32[1,64], index: 13, kind: input, shape index: {}]   ;;  %s656_s14 = inlined_call_operand.vmem [shape: f32[1,64], index: 14, kind: input, shape index: {}]   ;;  %s657_s15 = inlined_call_operand.vmem [shape: f32[64,32], index: 15, kind: input, shape index: {}]   ;;  %s658_s16 = inlined_call_operand.vmem [shape: f32[1,32], index: 16, kind: input, shape index: {}]   ;;  %s659_s17 = inlined_call_operand.hbm [shape: f32[8,32], index: 17, kind: output, shape index: {}]  }
   0x1   :  { %660 = sst [smem:[#allocation5_spill]] %s642_s0 }
   0x2   :  { %661 = sst [smem:[#allocation6_spill]] %s643_s1 }
   0x3   :  { %v106_v0 = vld [vmem:[%s645_s3 + $0x18] sm:$0xff]  ;;  %v105_v1 = vld [vmem:[%s645_s3 + $0x10] sm:$0xff]  ;;  %vm58_vm0 = vcmask 261120   ;;  %s662_s0 = sld [smem:[#allocation5_spill]]  ;;  %v104_v3 = vld [vmem:[%s645_s3 + $0x8] sm:$0xff] }
   0x4   :  { %126 = vmatpush.msra.mxu0 %v106_v0  ;;  %v103_v7 = vld [vmem:[%s645_s3] sm:$0xff] }
   0x6   :  { %127 = vmatpush.msra.mxu0 %v105_v1 }
   0x9   :  { %v57_v2 = vld [vmem:[%s662_s0] sm:$0xff] }
   0xa   :  { %v59_v4 = vsel %vm58_vm0, %v57_v2, 0.0  ;;  %v66_v5 = vmul.f32 %v57_v2, %v57_v2 }
   0xb   :  { %v60_v6 = vrot.slane %v59_v4, 4 }
   0xc   :  { %v67_v8 = vsel %vm58_vm0, %v66_v5, 0.0 }
   0xd   :  { %22 = vsyncpa [#allocation3], 0  ;;  %128 = vmatpush.msra.mxu0 %v104_v3  ;;  %v61_v9 = vadd.f32 %v60_v6, %v59_v4  ;;  %v68_v10 = vrot.slane %v67_v8, 4  ;;  %s663_s21 = sld [smem:[#allocation6_spill]]  ;;  %v92_v35 = vld [vmem:[%s644_s2] sm:$0x1] }
   0xe   :  { %v392_v42 = vld [vmem:[%s646_s4] ss:$0 sm:$0xff]  ;;  %vm135_vm4 = vcmask 523264   ;;  %v187_v52 = vld [vmem:[%s649_s7 + $0x38] sm:$0xff]  ;;  %v186_v55 = vld [vmem:[%s649_s7 + $0x30] sm:$0xff]  ;;  %vm216_vm8 = vcmask 130048  }
   0xf   :  { %129 = vmatpush.msra.mxu0 %v103_v7  ;;  %v62_v11 = vrot.slane %v61_v9, 2  ;;  %v69_v12 = vadd.f32 %v68_v10, %v67_v8  ;;  %203 = vmatpush.msra.mxu1 %v187_v52  ;;  %v185_v58 = vld [vmem:[%s649_s7 + $0x28] sm:$0xff]  ;;  %v184_v61 = vld [vmem:[%s649_s7 + $0x20] sm:$0xff]  ;;  %v183_v0 = vld [vmem:[%s649_s7 + $0x18] sm:$0xff]  ;;  %s378_s30 = sshll.u32 %s659_s17, 4  ;;  %s379_s30 = int_to_ptr.hbm [resolvable:$true] %s378_s30 }
  0x10   :  { %v182_v3 = vld [vmem:[%s649_s7 + $0x10] sm:$0xff]  ;;  %v181_v4 = vld [vmem:[%s649_s7 + $0x8] sm:$0xff]  ;;  %v180_v7 = vld [vmem:[%s649_s7] sm:$0xff] }
  0x11   :  { %v63_v13 = vadd.f32 %v62_v11, %v61_v9  ;;  %v70_v14 = vrot.slane %v69_v12, 2  ;;  %204 = vmatpush.msra.mxu1 %v186_v55 }
  0x13   :  { %v64_v15 = vrot.slane %v63_v13, 1  ;;  %v71_v16 = vadd.f32 %v70_v14, %v69_v12  ;;  %v79_v31 = vld [vmem:[%s663_s21] sm:$0x1]  ;;  %205 = vmatpush.msra.mxu1 %v185_v58 }
  0x15   :  { %v65_v17 = vadd.f32 %v64_v15, %v63_v13  ;;  %v72_v18 = vrot.slane %v71_v16, 1  ;;  %206 = vmatpush.msra.mxu1 %v184_v61 }
  0x17   :  { %v73_v19 = vadd.f32 %v72_v18, %v71_v16  ;;  %v74_v20 = vmul.f32 0.125, %v65_v17  ;;  %207 = vmatpush.msra.mxu1 %v183_v0  ;;  %v156_v16 = vld [vmem:[%s647_s5] sm:$0x1] }
  0x19   :  { %v75_v21 = vmul.f32 0.125, %v73_v19  ;;  %v76_v22 = vmul.f32 %v74_v20, %v74_v20  ;;  %208 = vmatpush.msra.mxu1 %v182_v3 }
  0x1b   :  { %v77_v23 = vsub.f32 %v75_v21, %v76_v22  ;;  %209 = vmatpush.msra.mxu1 %v181_v4 }
  0x1d   :  { %v78_v24 = vmax.f32 %v77_v23, 0.0  ;;  %210 = vmatpush.msra.mxu1 %v180_v7 }
  0x1f   :  { %v80_v25 = vadd.f32 1e-05, %v78_v24 }
  0x21   :  { %396 = vrsqrt.f32 %v80_v25  ;;  %vm87_vm1 = vweird.f32 %v80_v25 }
  0x27   :  { %v397_v26 = vpop.eup %396 }
  0x28   :  { %v82_v27 = vmul.f32 %v397_v26, %v80_v25  ;;  %vm88_vm2 = vweird.f32 %v397_v26 }
  0x29   :  { %vm89_vm3 = vmor %vm87_vm1, %vm88_vm2 }
  0x2a   :  { %v83_v28 = vmul.f32 %v397_v26, %v82_v27  ;;  %v262_v27 = vld [vmem:[%s653_s11 + $0x8] sm:$0xff] }
  0x2b   :  { %284 = vmatpush.msra.mxu2 %v262_v27 }
  0x2c   :  { %v84_v29 = vmul.f32 0.5, %v83_v28  ;;  %v261_v28 = vld [vmem:[%s653_s11] sm:$0xff] }
  0x2d   :  { %285 = vmatpush.msra.mxu2 %v261_v28  ;;  %v338_v28 = vld [vmem:[%s657_s15 + $0x18] sm:$0xff] }
  0x2e   :  { %v85_v30 = vsub.f32 1.5, %v84_v29  ;;  %v393_v29 = vld [vmem:[%s650_s8] ss:$0 sm:$0xff] }
  0x30   :  { %v86_v32 = vmul.f32 %v397_v26, %v85_v30 }
  0x32   :  { %v90_v33 = vsel %vm89_vm3, %v397_v26, %v86_v32 }
  0x33   :  { %v91_v34 = vmul.f32 %v90_v33, %v79_v31 }
  0x35   :  { %v93_v36 = vmul.f32 %v91_v34, %v74_v20  ;;  %v96_v37 = vperm.slane %v91_v34, 0  ;;  %v169_v20 = vld [vmem:[%s648_s6] sm:$0x1] }
  0x37   :  { %v94_v38 = vsub.f32 %v92_v35, %v93_v36  ;;  %v98_v39 = vmul.f32 %v96_v37, %v57_v2 }
  0x39   :  { %v100_v40 = vperm.slane %v94_v38, 0 }
  0x3b   :  { %v102_v41 = vadd.f32 %v100_v40, %v98_v39 }
  0x3d   :  { %387 = vmatmul.msk.f32.vlgmr.msra.gmra.mxu0 %vm58_vm0, %v102_v41 }
  0xba   :  { %v131_v43 = vpop.f32.mrf.mxu0 }
  0xbb   :  { %v132_v44 = vadd.f32 %v392_v42, %v131_v43 }
  0xbd   :  { %v134_v45 = vmax.f32 %v132_v44, 0.0 }
  0xbf   :  { %v136_v46 = vsel %vm135_vm4, %v134_v45, 0.0  ;;  %v143_v47 = vmul.f32 %v134_v45, %v134_v45 }
  0xc0   :  { %v137_v48 = vrot.slane %v136_v46, 4 }
  0xc1   :  { %v144_v49 = vsel %vm135_vm4, %v143_v47, 0.0 }
  0xc2   :  { %v138_v50 = vadd.f32 %v137_v48, %v136_v46  ;;  %v145_v51 = vrot.slane %v144_v49, 4 }
  0xc4   :  { %v139_v53 = vrot.slane %v138_v50, 2  ;;  %v146_v54 = vadd.f32 %v145_v51, %v144_v49 }
  0xc6   :  { %v140_v56 = vadd.f32 %v139_v53, %v138_v50  ;;  %v147_v57 = vrot.slane %v146_v54, 2 }
  0xc8   :  { %v141_v59 = vrot.slane %v140_v56, 1  ;;  %v148_v60 = vadd.f32 %v147_v57, %v146_v54 }
  0xca   :  { %v142_v62 = vadd.f32 %v141_v59, %v140_v56  ;;  %v149_v63 = vrot.slane %v148_v60, 1  ;;  %v237_v59 = vld [vmem:[%s651_s9] sm:$0x1] }
  0xcc   :  { %v150_v1 = vadd.f32 %v149_v63, %v148_v60  ;;  %v151_v2 = vmul.f32 0.125, %v142_v62  ;;  %v250_v63 = vld [vmem:[%s652_s10] sm:$0x1] }
  0xce   :  { %v152_v5 = vmul.f32 0.125, %v150_v1  ;;  %v153_v6 = vmul.f32 %v151_v2, %v151_v2 }
  0xd0   :  { %v154_v8 = vsub.f32 %v152_v5, %v153_v6  ;;  %v394_v6 = vld [vmem:[%s654_s12] ss:$0 sm:$0xff] }
  0xd2   :  { %v155_v9 = vmax.f32 %v154_v8, 0.0 }
  0xd4   :  { %v157_v10 = vadd.f32 1e-05, %v155_v9 }
  0xd6   :  { %398 = vrsqrt.f32 %v157_v10  ;;  %vm164_vm6 = vweird.f32 %v157_v10 }
  0xdc   :  { %v399_v11 = vpop.eup %398 }
  0xdd   :  { %v159_v12 = vmul.f32 %v399_v11, %v157_v10  ;;  %vm165_vm5 = vweird.f32 %v399_v11 }
  0xde   :  { %vm166_vm7 = vmor %vm164_vm6, %vm165_vm5 }
  0xdf   :  { %v160_v13 = vmul.f32 %v399_v11, %v159_v12 }
  0xe1   :  { %v161_v14 = vmul.f32 0.5, %v160_v13 }
  0xe3   :  { %v162_v15 = vsub.f32 1.5, %v161_v14 }
  0xe5   :  { %v163_v17 = vmul.f32 %v399_v11, %v162_v15 }
  0xe7   :  { %v167_v18 = vsel %vm166_vm7, %v399_v11, %v163_v17 }
  0xe8   :  { %v168_v19 = vmul.f32 %v167_v18, %v156_v16  ;;  %v342_v16 = vld [vmem:[%s657_s15 + $0x38] sm:$0xff] }
  0xe9   :  { %358 = vmatpush.msra.mxu3 %v342_v16 }
  0xea   :  { %v173_v21 = vperm.slane %v168_v19, 0  ;;  %v170_v22 = vmul.f32 %v168_v19, %v151_v2  ;;  %v341_v19 = vld [vmem:[%s657_s15 + $0x30] sm:$0xff] }
  0xeb   :  { %359 = vmatpush.msra.mxu3 %v341_v19 }
  0xec   :  { %v171_v23 = vsub.f32 %v169_v20, %v170_v22  ;;  %v175_v24 = vmul.f32 %v173_v21, %v134_v45  ;;  %v340_v22 = vld [vmem:[%s657_s15 + $0x28] sm:$0xff] }
  0xed   :  { %360 = vmatpush.msra.mxu3 %v340_v22 }
  0xee   :  { %v177_v25 = vperm.slane %v171_v23, 0 }
  0xf0   :  { %v179_v26 = vadd.f32 %v177_v25, %v175_v24  ;;  %v339_v25 = vld [vmem:[%s657_s15 + $0x20] sm:$0xff] }
  0xf1   :  { %361 = vmatpush.msra.mxu3 %v339_v25 }
  0xf2   :  { %388 = vmatmul.msk.f32.vlgmr.msra.gmra.mxu1 %vm135_vm4, %v179_v26 }
  0xf3   :  { %362 = vmatpush.msra.mxu3 %v338_v28 }
 0x16f   :  { %v212_v30 = vpop.f32.mrf.mxu1 }
 0x170   :  { %v213_v31 = vadd.f32 %v393_v29, %v212_v30 }
 0x172   :  { %v215_v32 = vmax.f32 %v213_v31, 0.0  ;;  %v337_v31 = vld [vmem:[%s657_s15 + $0x10] sm:$0xff] }
 0x173   :  { %363 = vmatpush.msra.mxu3 %v337_v31 }
 0x174   :  { %v224_v33 = vmul.f32 %v215_v32, %v215_v32  ;;  %v217_v34 = vsel %vm216_vm8, %v215_v32, 0.0 }
 0x175   :  { %v218_v35 = vrot.slane %v217_v34, 4 }
 0x176   :  { %v225_v36 = vsel %vm216_vm8, %v224_v33, 0.0 }
 0x177   :  { %v219_v37 = vadd.f32 %v218_v35, %v217_v34  ;;  %v226_v38 = vrot.slane %v225_v36, 4  ;;  %v335_v35 = vld [vmem:[%s657_s15] sm:$0xff] }
 0x179   :  { %v220_v39 = vrot.slane %v219_v37, 2  ;;  %v227_v40 = vadd.f32 %v226_v38, %v225_v36 }
 0x17b   :  { %v221_v41 = vadd.f32 %v220_v39, %v219_v37  ;;  %v228_v42 = vrot.slane %v227_v40, 2 }
 0x17d   :  { %v222_v43 = vrot.slane %v221_v41, 1  ;;  %v229_v44 = vadd.f32 %v228_v42, %v227_v40 }
 0x17f   :  { %v223_v45 = vadd.f32 %v222_v43, %v221_v41  ;;  %v230_v46 = vrot.slane %v229_v44, 1 }
 0x181   :  { %v231_v47 = vadd.f32 %v230_v46, %v229_v44  ;;  %v232_v48 = vmul.f32 0.125, %v223_v45  ;;  %v311_v44 = vld [vmem:[%s655_s13] sm:$0x1]  ;;  %s430_s13 = smov [#allocation2]  }
 0x182   :  { %s376_s11 = sshll.u32 %s430_s13, 4  ;;  %s377_s11 = int_to_ptr.vmem [resolvable:$true] %s376_s11 }
 0x183   :  { %v233_v49 = vmul.f32 0.125, %v231_v47  ;;  %v234_v50 = vmul.f32 %v232_v48, %v232_v48 }
 0x185   :  { %v235_v51 = vsub.f32 %v233_v49, %v234_v50 }
 0x187   :  { %v236_v52 = vmax.f32 %v235_v51, 0.0 }
 0x189   :  { %v238_v53 = vadd.f32 1e-05, %v236_v52 }
 0x18b   :  { %400 = vrsqrt.f32 %v238_v53  ;;  %vm245_vm10 = vweird.f32 %v238_v53 }
 0x191   :  { %v401_v54 = vpop.eup %400 }
 0x192   :  { %v240_v55 = vmul.f32 %v401_v54, %v238_v53  ;;  %vm246_vm9 = vweird.f32 %v401_v54 }
 0x193   :  { %vm247_vm11 = vmor %vm245_vm10, %vm246_vm9 }
 0x194   :  { %v241_v56 = vmul.f32 %v401_v54, %v240_v55  ;;  %v395_v55 = vld [vmem:[%s658_s16] ss:$0 sm:$0xff] }
 0x196   :  { %v242_v57 = vmul.f32 0.5, %v241_v56 }
 0x198   :  { %v243_v58 = vsub.f32 1.5, %v242_v57 }
 0x19a   :  { %v244_v60 = vmul.f32 %v401_v54, %v243_v58 }
 0x19c   :  { %v248_v61 = vsel %vm247_vm11, %v401_v54, %v244_v60 }
 0x19d   :  { %v249_v62 = vmul.f32 %v248_v61, %v237_v59 }
 0x19f   :  { %v251_v0 = vmul.f32 %v249_v62, %v232_v48  ;;  %v254_v1 = vperm.slane %v249_v62, 0  ;;  %v324_v48 = vld [vmem:[%s656_s14] sm:$0x1] }
 0x1a1   :  { %v252_v2 = vsub.f32 %v250_v63, %v251_v0  ;;  %v256_v3 = vmul.f32 %v254_v1, %v215_v32  ;;  %v336_v32 = vld [vmem:[%s657_s15 + $0x8] sm:$0xff] }
 0x1a2   :  { %364 = vmatpush.msra.mxu3 %v336_v32 }
 0x1a3   :  { %v258_v4 = vperm.slane %v252_v2, 0 }
 0x1a4   :  { %365 = vmatpush.msra.mxu3 %v335_v35 }
 0x1a5   :  { %v260_v5 = vadd.f32 %v258_v4, %v256_v3 }
 0x1a7   :  { %389 = vmatmul.msk.f32.vlgmr.msra.gmra.mxu2 %vm216_vm8, %v260_v5 }
 0x22a   :  { %v287_v7 = vpop.f32.mrf.mxu2 }
 0x22b   :  { %v288_v8 = vadd.f32 %v394_v6, %v287_v7 }
 0x22d   :  { %v290_v9 = vmax.f32 %v288_v8, 0.0 }
 0x22f   :  { %v291_v10 = vsel %vm135_vm4, %v290_v9, 0.0  ;;  %v298_v11 = vmul.f32 %v290_v9, %v290_v9 }
 0x230   :  { %v292_v12 = vrot.slane %v291_v10, 4 }
 0x231   :  { %v299_v13 = vsel %vm135_vm4, %v298_v11, 0.0 }
 0x232   :  { %v293_v14 = vadd.f32 %v292_v12, %v291_v10  ;;  %v300_v15 = vrot.slane %v299_v13, 4 }
 0x234   :  { %v294_v17 = vrot.slane %v293_v14, 2  ;;  %v301_v18 = vadd.f32 %v300_v15, %v299_v13 }
 0x236   :  { %v295_v20 = vadd.f32 %v294_v17, %v293_v14  ;;  %v302_v21 = vrot.slane %v301_v18, 2 }
 0x238   :  { %v296_v23 = vrot.slane %v295_v20, 1  ;;  %v303_v24 = vadd.f32 %v302_v21, %v301_v18 }
 0x23a   :  { %v297_v26 = vadd.f32 %v296_v23, %v295_v20  ;;  %v304_v27 = vrot.slane %v303_v24, 1 }
 0x23c   :  { %v305_v29 = vadd.f32 %v304_v27, %v303_v24  ;;  %v306_v30 = vmul.f32 0.125, %v297_v26 }
 0x23e   :  { %v307_v33 = vmul.f32 0.125, %v305_v29  ;;  %v308_v34 = vmul.f32 %v306_v30, %v306_v30 }
 0x240   :  { %v309_v36 = vsub.f32 %v307_v33, %v308_v34 }
 0x242   :  { %v310_v37 = vmax.f32 %v309_v36, 0.0 }
 0x244   :  { %v312_v38 = vadd.f32 1e-05, %v310_v37 }
 0x246   :  { %402 = vrsqrt.f32 %v312_v38  ;;  %vm319_vm13 = vweird.f32 %v312_v38 }
 0x24c   :  { %v403_v39 = vpop.eup %402 }
 0x24d   :  { %v314_v40 = vmul.f32 %v403_v39, %v312_v38  ;;  %vm320_vm12 = vweird.f32 %v403_v39 }
 0x24e   :  { %vm321_vm14 = vmor %vm319_vm13, %vm320_vm12 }
 0x24f   :  { %v315_v41 = vmul.f32 %v403_v39, %v314_v40 }
 0x251   :  { %v316_v42 = vmul.f32 0.5, %v315_v41 }
 0x253   :  { %v317_v43 = vsub.f32 1.5, %v316_v42 }
 0x255   :  { %v318_v45 = vmul.f32 %v403_v39, %v317_v43 }
 0x257   :  { %v322_v46 = vsel %vm321_vm14, %v403_v39, %v318_v45 }
 0x258   :  { %v323_v47 = vmul.f32 %v322_v46, %v311_v44 }
 0x25a   :  { %v328_v49 = vperm.slane %v323_v47, 0  ;;  %v325_v50 = vmul.f32 %v323_v47, %v306_v30 }
 0x25c   :  { %v326_v51 = vsub.f32 %v324_v48, %v325_v50  ;;  %v330_v52 = vmul.f32 %v328_v49, %v290_v9 }
 0x25e   :  { %v332_v53 = vperm.slane %v326_v51, 0 }
 0x260   :  { %v334_v54 = vadd.f32 %v332_v53, %v330_v52 }
 0x262   :  { %390 = vmatmul.msk.f32.vlgmr.msra.gmra.mxu3 %vm135_vm4, %v334_v54 }
 0x2e5   :  { %v367_v56 = vpop.f32.mrf.mxu3 }
 0x2e6   :  { %v368_v57 = vadd.f32 %v395_v55, %v367_v56 }
 0x2e8   :  { %370 = vst.msk [vmem:[#allocation2] sm:$0xff] %vm58_vm0, %v368_v57 }
 0x2e9   :  { %381 = dma.vmem_to_hbm [thread:$0]  %s377_s11, 128, %s379_s30, [#allocation3]  }
 0x2ea   :  { %428 = dma.done.wait [#allocation3], 128  }
 0x2eb   :  { %429 = vsyncadd [#allocation3], 4294967168 }
 0x2ec   :  { %386 = vsyncpa [#allocation3], 1 }

</bundles_post_ra>
